<compile_context>
chip_gen: v5e
topology: v5e:2x2
jax: 0.10.0
libtpu: 0.0.40
codegen_flags: <defaults>
</compile_context>

<pallas_src>
import functools

import jax
import jax.numpy as jnp
import numpy as np
from jax import lax
from jax.experimental import pallas as pl
from jax.experimental.pallas import tpu as pltpu


def _vmem_capacity_bytes():
    try:
        info = pltpu.get_tpu_info()
        cap = getattr(info, "vmem_capacity_bytes", None)
        if cap:
            return int(cap)
    except Exception:
        pass
    return 64 << 20  # conservative (v7x-sized) fallback


# ---------------------------------------------------------------------------
# Kernel 1: meta_net MLP fused with the ctx broadcast-add.
#   ctx_shifted[b, j, :] = ctx[j, :] + (relu(x[b] @ W1 + b1) @ W2 + b2)
# ---------------------------------------------------------------------------
def _meta_net_ctx_kernel(x_ref, w1_ref, b1_ref, w2_ref, b2_ref, ctx_ref, out_ref):
    # Native-dtype MXU inputs (bf16 stays bf16), f32 accumulation.
    h = jnp.dot(x_ref[...], w1_ref[...], preferred_element_type=jnp.float32)
    h = jnp.maximum(h + b1_ref[...].astype(jnp.float32), 0.0)          # ReLU
    bias = jnp.dot(h, w2_ref[...], preferred_element_type=jnp.float32)
    bias = bias + b2_ref[...].astype(jnp.float32)                      # [bt, ctx_dim]
    shifted = ctx_ref[...].astype(jnp.float32)[None, :, :] + bias[:, None, :]
    out_ref[...] = shifted.astype(out_ref.dtype)


def meta_net_ctx_shifted(im_features, w1, b1, w2, b2, ctx, out_dtype):
    B, vis_dim = im_features.shape
    hidden = w1.shape[1]
    n_ctx, ctx_dim = ctx.shape
    bt = B if B <= 256 else 256   # multiple-of-8 row tiles when B is large
    return pl.pallas_call(
        _meta_net_ctx_kernel,
        out_shape=jax.ShapeDtypeStruct((B, n_ctx, ctx_dim), out_dtype),
        grid=(pl.cdiv(B, bt),),
        in_specs=[
            pl.BlockSpec((bt, vis_dim), lambda i: (i, 0)),
            pl.BlockSpec((vis_dim, hidden), lambda i: (0, 0)),
            pl.BlockSpec((1, hidden), lambda i: (0, 0)),
            pl.BlockSpec((hidden, ctx_dim), lambda i: (0, 0)),
            pl.BlockSpec((1, ctx_dim), lambda i: (0, 0)),
            pl.BlockSpec((n_ctx, ctx_dim), lambda i: (0, 0)),
        ],
        out_specs=pl.BlockSpec((bt, n_ctx, ctx_dim), lambda i: (i, 0, 0)),
        compiler_params=pltpu.CompilerParams(dimension_semantics=("parallel",)),
    )(im_features, w1, b1, w2, b2, ctx)


# ---------------------------------------------------------------------------
# Kernel 2: prompt assembly (pure copy + ctx-row overwrite), flattened lane layout.
#   out[b, c, :] = embedding_flat[c, :]                               (bulk slab store)
#   out[b, c, dim : (1+n_ctx)*dim] = ctx_shifted_flat[b, :]           (8-class groups)
# ---------------------------------------------------------------------------
def _assemble_kernel(emb_ref, ctxs_ref, out_ref, *, n_ctx, dim, b_tile, batch):
    # emb_ref : (c_tile, seq*dim)      -- resident across the inner batch axis
    # ctxs_ref: (B, n_ctx*dim)         -- whole array resident in VMEM
    # out_ref : (b_tile, c_tile, seq*dim)
    c_tile = out_ref.shape[1]
    ctx_len = n_ctx * dim
    group = 8 if c_tile >= 8 else c_tile
    n_full = c_tile // group
    rem = c_tile - n_full * group
    b_base = pl.program_id(1) * b_tile

    for i in range(b_tile):  # b_tile is small (<= 8), static unroll
        # Bulk copy of the whole class-embedding slab (prefix + suffix come for free).
        out_ref[i, :, :] = emb_ref[...]
        # Overwrite the context lanes with this batch row's shifted context.
        b_idx = jnp.minimum(b_base + i, batch - 1)      # clamp for padded batch tiles
        row = ctxs_ref[pl.ds(b_idx, 1), :]              # (1, n_ctx*dim)
        if n_full > 0:
            blk = jnp.broadcast_to(row, (group, ctx_len))   # only ~8 sublanes live

            def body(g, carry, _blk=blk, _i=i):
                g0 = pl.multiple_of(g * group, group)
                out_ref[_i, pl.ds(g0, group), pl.ds(dim, ctx_len)] = _blk
                return carry

            lax.fori_loop(0, n_full, body, 0, unroll=n_full <= 8)
        if rem > 0:
            out_ref[i, pl.ds(n_full * group, rem), pl.ds(dim, ctx_len)] = (
                jnp.broadcast_to(row, (rem, ctx_len)))


def _plan_assembly_tiles(n_cls, B, slab_bytes, budget):
    """Pick (c_tile, b_tile). c_tile must be a multiple of 8 or equal n_cls."""
    if n_cls < 8:
        c_tile = n_cls
    else:
        # 2x double-buffered (emb-in + out with b_tile=1) per class row.
        fit = int(budget // max(4 * slab_bytes, 1))
        c_tile = n_cls if fit >= n_cls else max(8, (min(fit, n_cls) // 8) * 8)
    b_tile = 1
    if c_tile == n_cls:
        extra = int(budget // max(2 * n_cls * slab_bytes, 1)) - 1
        b_tile = max(1, min(B, min(extra, 8)))
    # Keep at least 2 grid steps along a parallel axis when possible (v7x has 2 TCs).
    n_c = -(-n_cls // c_tile)
    n_b = -(-B // b_tile)
    if n_c * n_b < 2:
        if c_tile >= 16:
            c_tile = max(8, ((c_tile // 2) // 8) * 8)
        elif b_tile >= 2:
            b_tile = max(1, b_tile // 2)
    return c_tile, b_tile


def assemble_prompts(embedding, ctx_shifted, n_ctx):
    n_cls, seq, dim = embedding.shape
    B = ctx_shifted.shape[0]
    flat = seq * dim
    ctx_len = n_ctx * dim
    itemsize = jnp.dtype(embedding.dtype).itemsize

    # Contiguous-dim reshapes in the wrapper are free; they give lane-dense blocks.
    emb_flat = embedding.reshape(n_cls, flat)
    ctxs_flat = ctx_shifted.reshape(B, ctx_len).astype(embedding.dtype)

    vmem_cap = _vmem_capacity_bytes()
    budget = (52 << 20) if vmem_cap >= (96 << 20) else (24 << 20)
    c_tile, b_tile = _plan_assembly_tiles(n_cls, B, flat * itemsize, budget)
    grid = (pl.cdiv(n_cls, c_tile), pl.cdiv(B, b_tile))

    # vmem_limit derived from the actual double-buffered block bytes (+ headroom).
    blocks_bytes = 2 * (c_tile * flat * itemsize
                        + b_tile * c_tile * flat * itemsize
                        + B * ctx_len * itemsize)
    vmem_limit = int(max(16 << 20, min(blocks_bytes + (8 << 20), int(vmem_cap * 0.9))))

    kernel = functools.partial(_assemble_kernel, n_ctx=n_ctx, dim=dim,
                               b_tile=b_tile, batch=B)

    out_flat = pl.pallas_call(
        kernel,
        out_shape=jax.ShapeDtypeStruct((B, n_cls, flat), embedding.dtype),
        # Class axis OUTER, batch INNER: the big embedding tile is DMA'd once per class
        # tile (block index independent of the inner axis); ctx_shifted is resident.
        grid=grid,
        in_specs=[
            pl.BlockSpec((c_tile, flat), lambda c, b: (c, 0)),
            pl.BlockSpec((B, ctx_len), lambda c, b: (0, 0)),
        ],
        out_specs=pl.BlockSpec((b_tile, c_tile, flat), lambda c, b: (b, c, 0)),
        compiler_params=pltpu.CompilerParams(
            dimension_semantics=("parallel", "parallel"),
            vmem_limit_bytes=vmem_limit),
    )(emb_flat, ctxs_flat)
    return out_flat.reshape(B, n_cls, seq, dim)


# ---------------------------------------------------------------------------
# Module-like wrapper with deterministic synthetic parameters.
# ---------------------------------------------------------------------------
class SpecificTextualPromptPallas:
    def __init__(self, key, *, n_ctx, ctx_dim, vis_dim, vocab_size, seq_len,
                 num_classes, dtype=jnp.float32):
        self.n_ctx = n_ctx
        self.ctx_dim = ctx_dim
        self.vis_dim = vis_dim
        self.seq_len = seq_len
        self.dtype = dtype
        hidden = max(vis_dim // 16, 1)

        ks = jax.random.split(key, 7)
        # ctx ~ N(0, 0.02) as in nn.init.normal_(std=0.02)
        self.ctx = (0.02 * jax.random.normal(ks[0], (n_ctx, ctx_dim))).astype(dtype)
        # meta_net: Linear(vis_dim, vis_dim//16) -> ReLU -> Linear(vis_dim//16, ctx_dim)
        self.w1 = (jax.random.normal(ks[1], (vis_dim, hidden)) / np.sqrt(vis_dim)).astype(dtype)
        self.b1 = jnp.zeros((1, hidden), dtype)
        self.w2 = (jax.random.normal(ks[2], (hidden, ctx_dim)) / np.sqrt(hidden)).astype(dtype)
        self.b2 = jnp.zeros((1, ctx_dim), dtype)
        # synthetic "clip.tokenize" table: one fixed token sequence per class
        self.class_tokens = jax.random.randint(ks[3], (num_classes, seq_len), 0, vocab_size,
                                               dtype=jnp.int32)
        # synthetic clip_model.token_embedding weight
        self.token_table = (0.02 * jax.random.normal(ks[4], (vocab_size, ctx_dim))).astype(dtype)

    def forward(self, im_features, class_idxs, use_bias):
        # Glue: tokenize + token_embedding lookup (done under no_grad in PyTorch).
        tokenized_prompts = self.class_tokens[class_idxs]           # [n_cls, seq_len]
        embedding = self.token_table[tokenized_prompts]             # [n_cls, seq_len, ctx_dim]

        B = im_features.shape[0]
        if use_bias:
            ctx_shifted = meta_net_ctx_shifted(
                im_features, self.w1, self.b1, self.w2, self.b2, self.ctx,
                out_dtype=embedding.dtype)                          # [B, n_ctx, ctx_dim]
        else:
            ctx_shifted = jnp.broadcast_to(
                self.ctx[None], (B, self.n_ctx, self.ctx_dim)).astype(embedding.dtype)

        special_prompts = assemble_prompts(embedding, ctx_shifted, self.n_ctx)
        return special_prompts, tokenized_prompts


# ---------------------------------------------------------------------------
# Pure-JAX reference of the forward (for correctness check).
# ---------------------------------------------------------------------------
def reference_forward(mod, im_features, class_idxs, use_bias):
    tokenized = mod.class_tokens[class_idxs]
    emb = mod.token_table[tokenized]                                # [n_cls, seq, dim]
    prefix = emb[:, :1, :]
    suffix = emb[:, 1 + mod.n_ctx:, :]
    if use_bias:
        h = jnp.maximum(im_features @ mod.w1 + mod.b1, 0.0)
        bias = h @ mod.w2 + mod.b2                                  # [B, dim]
        ctx_shifted = mod.ctx[None, :, :] + bias[:, None, :]        # [B, n_ctx, dim]
    else:
        B = im_features.shape[0]
        ctx_shifted = jnp.broadcast_to(mod.ctx[None], (B, mod.n_ctx, mod.ctx_dim))
    n_cls = emb.shape[0]
    outs = []
    for b in range(ctx_shifted.shape[0]):
        ctx_i = jnp.broadcast_to(ctx_shifted[b][None], (n_cls, mod.n_ctx, mod.ctx_dim))
        outs.append(jnp.concatenate([prefix, ctx_i.astype(emb.dtype), suffix], axis=1))
    return jnp.stack(outs), tokenized


if __name__ == "__main__":
    root = jax.random.PRNGKey(0)
    k1, k2, kin1, kin2 = jax.random.split(root, 4)

    # Config 1: tiny batch, n_cls < 8 (full class tile; batch axis carried by the grid).
    mod1 = SpecificTextualPromptPallas(
        k1, n_ctx=4, ctx_dim=128, vis_dim=128, vocab_size=50, seq_len=16, num_classes=7)
    im1 = jax.random.normal(kin1, (2, 128), dtype=jnp.float32)
    cls1 = jnp.array([0, 2, 4, 6], dtype=jnp.int32)

    # Config 2: n_cls >= 8 and B not divisible by b_tile (exercises 8-class grouped
    # overwrite + remainder, the b_tile>1 path and padded batch-tile writeback).
    mod2 = SpecificTextualPromptPallas(
        k2, n_ctx=4, ctx_dim=128, vis_dim=128, vocab_size=64, seq_len=16, num_classes=16)
    im2 = jax.random.normal(kin2, (5, 128), dtype=jnp.float32)
    cls2 = jnp.arange(12, dtype=jnp.int32)

    for mod, im, cls in ((mod1, im1, cls1), (mod2, im2, cls2)):
        for use_bias in (True, False):
            out, toks = mod.forward(im, cls, use_bias)
            out = jax.block_until_ready(out)
            ref_out, ref_toks = reference_forward(mod, im, cls, use_bias)
            np.testing.assert_allclose(np.asarray(out), np.asarray(ref_out),
                                       rtol=1e-5, atol=1e-5)
            np.testing.assert_array_equal(np.asarray(toks), np.asarray(ref_toks))

    print("KERNEL_OK")
</pallas_src>

<mosaic_0001>
module attributes {stable_mosaic.version = 11 : i64} {
  func.func @_meta_net_ctx_kernel(%arg0: i32, %arg1: memref<2x128xf32, #tpu.memory_space<vmem>>, %arg2: memref<128x8xf32, #tpu.memory_space<vmem>>, %arg3: memref<1x8xf32, #tpu.memory_space<vmem>>, %arg4: memref<8x128xf32, #tpu.memory_space<vmem>>, %arg5: memref<1x128xf32, #tpu.memory_space<vmem>>, %arg6: memref<4x128xf32, #tpu.memory_space<vmem>>, %arg7: memref<2x4x128xf32, #tpu.memory_space<vmem>>) attributes {dimension_semantics = [#tpu.dimension_semantics<parallel>], iteration_bounds = array<i64: 1>, scalar_prefetch = 0 : i64, scratch_operands = 0 : i64, tpu.core_type = #tpu.core_type<tc>, window_params = [{transform_indices = @transform_0, window_bounds = array<i64: 2, 128>}, {pipeline_mode = #tpu.pipeline_mode<synchronous>, transform_indices = @transform_1, window_bounds = array<i64: 128, 8>}, {pipeline_mode = #tpu.pipeline_mode<synchronous>, transform_indices = @transform_2, window_bounds = array<i64: 1, 8>}, {pipeline_mode = #tpu.pipeline_mode<synchronous>, transform_indices = @transform_3, window_bounds = array<i64: 8, 128>}, {pipeline_mode = #tpu.pipeline_mode<synchronous>, transform_indices = @transform_4, window_bounds = array<i64: 1, 128>}, {pipeline_mode = #tpu.pipeline_mode<synchronous>, transform_indices = @transform_5, window_bounds = array<i64: 4, 128>}, {transform_indices = @transform_6, window_bounds = array<i64: 2, 4, 128>}]} {
    %c0 = arith.constant 0 : index
    %c0_0 = arith.constant 0 : index
    %0 = vector.load %arg1[%c0, %c0_0] : memref<2x128xf32, #tpu.memory_space<vmem>>, vector<2x128xf32>
    %c0_1 = arith.constant 0 : index
    %c0_2 = arith.constant 0 : index
    %1 = vector.load %arg2[%c0_1, %c0_2] : memref<128x8xf32, #tpu.memory_space<vmem>>, vector<128x8xf32>
    %cst = arith.constant dense<0.000000e+00> : vector<2x8xf32>
    %2 = tpu.matmul %0, %1, %cst {dimension_numbers = #tpu.dot_dimension_numbers<[1], [0], [0], [1], [0, 0, 1, 1], [], []>} : vector<2x128xf32>, vector<128x8xf32>, vector<2x8xf32> -> vector<2x8xf32>
    %c0_3 = arith.constant 0 : index
    %c0_4 = arith.constant 0 : index
    %3 = vector.load %arg3[%c0_3, %c0_4] : memref<1x8xf32, #tpu.memory_space<vmem>>, vector<1x8xf32>
    %4 = vector.broadcast %3 : vector<1x8xf32> to vector<2x8xf32>
    %5 = arith.addf %2, %4 : vector<2x8xf32>
    %cst_5 = arith.constant 0.000000e+00 : f32
    %6 = vector.broadcast %cst_5 : f32 to vector<2x8xf32>
    %7 = arith.maximumf %5, %6 : vector<2x8xf32>
    %c0_6 = arith.constant 0 : index
    %c0_7 = arith.constant 0 : index
    %8 = vector.load %arg4[%c0_6, %c0_7] : memref<8x128xf32, #tpu.memory_space<vmem>>, vector<8x128xf32>
    %cst_8 = arith.constant dense<0.000000e+00> : vector<2x128xf32>
    %9 = tpu.matmul %7, %8, %cst_8 {dimension_numbers = #tpu.dot_dimension_numbers<[1], [0], [0], [1], [0, 0, 1, 1], [], []>} : vector<2x8xf32>, vector<8x128xf32>, vector<2x128xf32> -> vector<2x128xf32>
    %c0_9 = arith.constant 0 : index
    %c0_10 = arith.constant 0 : index
    %10 = vector.load %arg5[%c0_9, %c0_10] : memref<1x128xf32, #tpu.memory_space<vmem>>, vector<1x128xf32>
    %11 = vector.broadcast %10 : vector<1x128xf32> to vector<2x128xf32>
    %12 = arith.addf %9, %11 : vector<2x128xf32>
    %c0_11 = arith.constant 0 : index
    %c0_12 = arith.constant 0 : index
    %13 = vector.load %arg6[%c0_11, %c0_12] : memref<4x128xf32, #tpu.memory_space<vmem>>, vector<4x128xf32>
    %14 = vector.shape_cast %13 : vector<4x128xf32> to vector<1x4x128xf32>
    %15 = vector.shape_cast %12 : vector<2x128xf32> to vector<2x1x128xf32>
    %16 = vector.broadcast %14 : vector<1x4x128xf32> to vector<2x4x128xf32>
    %17 = vector.broadcast %15 : vector<2x1x128xf32> to vector<2x4x128xf32>
    %18 = arith.addf %16, %17 : vector<2x4x128xf32>
    %c0_13 = arith.constant 0 : index
    %c0_14 = arith.constant 0 : index
    %c0_15 = arith.constant 0 : index
    %19 = vector.load %arg7[%c0_13, %c0_14, %c0_15] : memref<2x4x128xf32, #tpu.memory_space<vmem>>, vector<2x4x128xf32>
    tpu.vector_store %arg7[%c0_13, %c0_14, %c0_15], %18 {strides = array<i32>} : memref<2x4x128xf32, #tpu.memory_space<vmem>>, vector<2x4x128xf32>,
    return
  }
  func.func @transform_0(%arg0: i32) -> (i32, i32) {
    %c0_i32 = arith.constant 0 : i32
    %c0_i32_0 = arith.constant 0 : i32
    return %arg0, %c0_i32 : i32, i32
  }
  func.func @transform_1(%arg0: i32) -> (i32, i32) {
    %c0_i32 = arith.constant 0 : i32
    %c0_i32_0 = arith.constant 0 : i32
    %c0_i32_1 = arith.constant 0 : i32
    return %c0_i32, %c0_i32_0 : i32, i32
  }
  func.func @transform_2(%arg0: i32) -> (i32, i32) {
    %c0_i32 = arith.constant 0 : i32
    %c0_i32_0 = arith.constant 0 : i32
    %c0_i32_1 = arith.constant 0 : i32
    return %c0_i32, %c0_i32_0 : i32, i32
  }
  func.func @transform_3(%arg0: i32) -> (i32, i32) {
    %c0_i32 = arith.constant 0 : i32
    %c0_i32_0 = arith.constant 0 : i32
    %c0_i32_1 = arith.constant 0 : i32
    return %c0_i32, %c0_i32_0 : i32, i32
  }
  func.func @transform_4(%arg0: i32) -> (i32, i32) {
    %c0_i32 = arith.constant 0 : i32
    %c0_i32_0 = arith.constant 0 : i32
    %c0_i32_1 = arith.constant 0 : i32
    return %c0_i32, %c0_i32_0 : i32, i32
  }
  func.func @transform_5(%arg0: i32) -> (i32, i32) {
    %c0_i32 = arith.constant 0 : i32
    %c0_i32_0 = arith.constant 0 : i32
    %c0_i32_1 = arith.constant 0 : i32
    return %c0_i32, %c0_i32_0 : i32, i32
  }
  func.func @transform_6(%arg0: i32) -> (i32, i32, i32) {
    %c0_i32 = arith.constant 0 : i32
    %c0_i32_0 = arith.constant 0 : i32
    %c0_i32_1 = arith.constant 0 : i32
    return %arg0, %c0_i32, %c0_i32_0 : i32, i32, i32
  }
}

</mosaic_0001>

<bundles_post_ra>
// kernel: tpu_custom_call.1
= control target key start
LH: loop header
LB: loop body
LE: loop exit
PB: predicated region body
PF: predicated region fallthrough
CT: control target
= control target key end

     0   :  { %s260_s0 = inlined_call_operand.vmem [shape: f32[2,128], index: 0, kind: input, shape index: {}]   ;;  %s261_s1 = inlined_call_operand.vmem [shape: f32[128,8], index: 1, kind: input, shape index: {}]   ;;  %s262_s2 = inlined_call_operand.vmem [shape: f32[1,8], index: 2, kind: input, shape index: {}]   ;;  %s263_s3 = inlined_call_operand.vmem [shape: f32[8,128], index: 3, kind: input, shape index: {}]   ;;  %s264_s4 = inlined_call_operand.vmem [shape: f32[1,128], index: 4, kind: input, shape index: {}]   ;;  %s265_s5 = inlined_call_operand.vmem [shape: f32[4,128], index: 5, kind: input, shape index: {}]   ;;  %s266_s6 = inlined_call_operand.hbm [shape: f32[2,4,128], index: 6, kind: output, shape index: {}]  }
   0x1   :  { %v40_v0 = vld [vmem:[%s261_s1 + $0x78] sm:$0xff]  ;;  %v39_v1 = vld [vmem:[%s261_s1 + $0x70] sm:$0xff]  ;;  %v38_v2 = vld [vmem:[%s261_s1 + $0x68] sm:$0xff] }
   0x2   :  { %45 = vmatpush.msra.mxu0 %v40_v0  ;;  %v37_v3 = vld [vmem:[%s261_s1 + $0x60] sm:$0xff]  ;;  %v36_v4 = vld [vmem:[%s261_s1 + $0x58] sm:$0xff] }
   0x4   :  { %46 = vmatpush.msra.mxu0 %v39_v1 }
   0x6   :  { %47 = vmatpush.msra.mxu0 %v38_v2 }
   0x7   :  { %11 = vsyncpa [#allocation3], 0  ;;  %v35_v5 = vld [vmem:[%s261_s1 + $0x50] sm:$0xff]  ;;  %v34_v6 = vld [vmem:[%s261_s1 + $0x48] sm:$0xff]  ;;  %vm71_vm0 = vcmask 64512   ;;  %s112_s15 = sshll.u32 %s266_s6, 4  ;;  %s113_s15 = int_to_ptr.hbm [resolvable:$true] %s112_s15 }
   0x8   :  { %48 = vmatpush.msra.mxu0 %v37_v3  ;;  %v33_v7 = vld [vmem:[%s261_s1 + $0x40] sm:$0xff]  ;;  %v32_v8 = vld [vmem:[%s261_s1 + $0x38] sm:$0xff]  ;;  %v31_v9 = vld [vmem:[%s261_s1 + $0x30] sm:$0xff]  ;;  %s158_s16 = smov 4  }
   0x9   :  { %v30_v10 = vld [vmem:[%s261_s1 + $0x28] sm:$0xff]  ;;  %v29_v11 = vld [vmem:[%s261_s1 + $0x20] sm:$0xff]  ;;  %v28_v12 = vld [vmem:[%s261_s1 + $0x18] sm:$0xff] }
   0xa   :  { %49 = vmatpush.msra.mxu0 %v36_v4  ;;  %v27_v13 = vld [vmem:[%s261_s1 + $0x10] sm:$0xff]  ;;  %v26_v14 = vld [vmem:[%s261_s1 + $0x8] sm:$0xff]  ;;  %v25_v15 = vld [vmem:[%s261_s1] sm:$0xff] }
   0xb   :  { %v24_v16 = vld [vmem:[%s260_s0] sm:$0x3] }
   0xc   :  { %50 = vmatpush.msra.mxu0 %v35_v5  ;;  %v66_v17 = vld [vmem:[%s263_s3] sm:$0xff]  ;;  %s156_s3 = smov [#allocation2]  }
   0xd   :  { %90 = vmatpush.msra.mxu1 %v66_v17  ;;  %v128_v18 = vld [vmem:[%s262_s2] ss:$0 sm:$0xff]  ;;  %s110_s13 = sshll.u32 %s156_s3, 4  ;;  %s111_s13 = int_to_ptr.vmem [resolvable:$true] %s110_s13 }
   0xe   :  { %51 = vmatpush.msra.mxu0 %v34_v6  ;;  %v129_v22 = vld [vmem:[%s264_s4] ss:$0 sm:$0xff]  ;;  %s157_s4 = smov 64  }
   0xf   :  { %v95_v25 = vld [vmem:[%s265_s5] sm:$0xf] }
  0x10   :  { %52 = vmatpush.msra.mxu0 %v33_v7 }
  0x12   :  { %53 = vmatpush.msra.mxu0 %v32_v8 }
  0x14   :  { %54 = vmatpush.msra.mxu0 %v31_v9 }
  0x16   :  { %55 = vmatpush.msra.mxu0 %v30_v10 }
  0x18   :  { %56 = vmatpush.msra.mxu0 %v29_v11 }
  0x1a   :  { %57 = vmatpush.msra.mxu0 %v28_v12 }
  0x1c   :  { %58 = vmatpush.msra.mxu0 %v27_v13 }
  0x1e   :  { %59 = vmatpush.msra.mxu0 %v26_v14 }
  0x20   :  { %60 = vmatpush.msra.mxu0 %v25_v15 }
  0x21   :  { %61 = vmatmul.f32.vlgmr.msra.gmra.mxu0 %v24_v16 }
  0x9e   :  { %v62_v19 = vpop.f32.mrf.mxu0 }
  0x9f   :  { %v63_v20 = vadd.f32 %v128_v18, %v62_v19 }
  0xa1   :  { %v65_v21 = vmax.f32 %v63_v20, 0.0 }
  0xa3   :  { %124 = vmatmul.msk.f32.vlgmr.msra.gmra.mxu1 %vm71_vm0, %v65_v21 }
 0x120   :  { %v92_v23 = vpop.f32.mrf.mxu1 }
 0x121   :  { %v93_v24 = vadd.f32 %v129_v22, %v92_v23 }
 0x123   :  { %v97_v26 = vrot.slane %v93_v24, 1  ;;  %v98_v27 = vperm.slane %v93_v24, 0 }
 0x125   :  { %v99_v28 = vperm.slane %v97_v26, 0  ;;  %v102_v29 = vadd.f32 %v98_v27, %v95_v25 }
 0x127   :  { %v103_v30 = vadd.f32 %v99_v28, %v95_v25  ;;  %104 = vst [vmem:[#allocation2] sm:$0xf] %v102_v29 }
 0x129   :  { %105 = vst [vmem:[#allocation2 + $0x4] sm:$0xf] %v103_v30 }
 0x12a   :  { %118 = dma.vmem_to_hbm [thread:$0]  %s111_s13, 128, %s113_s15, [#allocation3], %s157_s4, %s157_s4, %s158_s16  }
 0x12b   :  { %154 = dma.done.wait [#allocation3], 128  }
 0x12c   :  { %155 = vsyncadd [#allocation3], 4294967168 }
 0x12d   :  { %123 = vsyncpa [#allocation3], 1 }

</bundles_post_ra>
